<compile_context>
chip_gen: v7x
topology: tpu7x:2x2x1
jax: 0.10.0
libtpu: 0.0.40
codegen_flags: <defaults>
</compile_context>

<pallas_src>
import jax
import jax.numpy as jnp
from jax.experimental import pallas as pl
from jax.experimental.pallas import tpu as pltpu

INPUT_SIZE = 10
HIDDEN_SIZE = 5
OUTPUT_SIZE = 1


def _round_up(n, m):
    return ((n + m - 1) // m) * m


def simple_nn_kernel(w1_ref, b1_ref, w2_ref, b2_ref, x_ref, o_ref):
    """One batch tile of the row-packed MLP.

    x_ref : (BG, R*INPUT_SIZE)   R batch rows packed per row        (VMEM)
    w1_ref: (R*INPUT_SIZE, R*HIDDEN_SIZE) block-diagonal fc1 weight (VMEM)
    b1_ref: (1, R*HIDDEN_SIZE)   fc1 bias, repeated per packed col  (VMEM)
    w2_ref: (1, R*HIDDEN_SIZE)   fc2 weight, repeated per packed col(VMEM)
    b2_ref: (1,)                 fc2 bias                           (SMEM)
    o_ref : (BG, R)              one output per batch row
    """
    r = o_ref.shape[1]
    # fc1 for R batch rows at once on the MXU.  The block-diagonal weight
    # keeps rows independent; column m*R + j holds hidden unit m of sub-row j.
    h = jnp.dot(x_ref[...], w1_ref[...], preferred_element_type=jnp.float32)
    h = jnp.maximum(h + b1_ref[...], 0.0) * w2_ref[...]
    # fc2: sum the HIDDEN_SIZE lane-slices (static, contiguous) on the VPU.
    out = h[:, 0:r]
    for m in range(1, HIDDEN_SIZE):
        out = out + h[:, m * r:(m + 1) * r]
    o_ref[...] = out + b2_ref[0]


def simple_nn_forward(x, w1, b1, w2, b2, *, max_tile_rows=16384):
    """x: (B, INPUT_SIZE) f32 -> (B, OUTPUT_SIZE) f32.

    w1: (INPUT_SIZE, HIDDEN_SIZE), b1: (1, HIDDEN_SIZE),
    w2: (HIDDEN_SIZE, OUTPUT_SIZE), b2: (1, OUTPUT_SIZE)
    (i.e. x @ W1 + b1, ReLU, @ W2 + b2 — same math as the PyTorch module).
    """
    x = x.astype(jnp.float32)
    batch = x.shape[0]
    assert x.shape[1] == INPUT_SIZE

    # Row-packing factor R: prefer one that divides the batch so the packing
    # reshape is a free row-major view (no pad, no extra HBM pass).
    if batch % 16 == 0:
        r = 16
    elif batch % 8 == 0:
        r = 8
    else:
        r = 16  # ragged batch: pad a few rows (only case that copies x)
    b_pad = _round_up(batch, r)
    if b_pad != batch:
        x = jnp.pad(x, ((0, b_pad - batch), (0, 0)))
    groups = b_pad // r
    x_packed = x.reshape(groups, r * INPUT_SIZE)     # contiguous row-major view

    # Packed parameters (tiny: <= ~51 KiB total, built once per call).
    w1f = w1.astype(jnp.float32)
    eye_r = jnp.eye(r, dtype=jnp.float32)
    # w1_big[j*10 + k, m*r + p] = w1[k, m] * (j == p)
    w1_big = jnp.einsum("km,jp->jkmp", w1f, eye_r).reshape(
        r * INPUT_SIZE, r * HIDDEN_SIZE)
    b1_rep = jnp.repeat(jnp.reshape(b1, (HIDDEN_SIZE,)).astype(jnp.float32),
                        r).reshape(1, r * HIDDEN_SIZE)
    w2_rep = jnp.repeat(jnp.reshape(w2, (HIDDEN_SIZE,)).astype(jnp.float32),
                        r).reshape(1, r * HIDDEN_SIZE)
    b2_flat = jnp.reshape(b2, (1,)).astype(jnp.float32)

    # Batch tiling, in packed rows.  Large tiles amortize per-step overhead;
    # keep >= 2 grid steps for big batches so both v7x TensorCores are used.
    max_g = max(8, max_tile_rows // r)
    split_g = max(8, 4096 // r)
    if groups > max_g:
        bg = max_g
    elif groups >= 2 * split_g:
        bg = _round_up((groups + 1) // 2, 8)
    else:
        bg = groups
    num_blocks = (groups + bg - 1) // bg

    out_packed = pl.pallas_call(
        simple_nn_kernel,
        out_shape=jax.ShapeDtypeStruct((groups, r), jnp.float32),
        grid=(num_blocks,),
        in_specs=[
            pl.BlockSpec((r * INPUT_SIZE, r * HIDDEN_SIZE), lambda i: (0, 0)),
            pl.BlockSpec((1, r * HIDDEN_SIZE), lambda i: (0, 0)),
            pl.BlockSpec((1, r * HIDDEN_SIZE), lambda i: (0, 0)),
            pl.BlockSpec(memory_space=pltpu.MemorySpace.SMEM),
            pl.BlockSpec((bg, r * INPUT_SIZE), lambda i: (i, 0)),
        ],
        out_specs=pl.BlockSpec((bg, r), lambda i: (i, 0)),
        compiler_params=pltpu.CompilerParams(
            dimension_semantics=("parallel",)),
    )(w1_big, b1_rep, w2_rep, b2_flat, x_packed)

    # (groups, R) rows are exactly batch rows g*R + j -> free flatten + slice.
    return out_packed.reshape(b_pad, OUTPUT_SIZE)[:batch]


def init_params(key):
    # Deterministic synthetic init (uniform, like PyTorch's default Linear init).
    k1, k2, k3, k4 = jax.random.split(key, 4)
    bound1 = 1.0 / jnp.sqrt(INPUT_SIZE)
    bound2 = 1.0 / jnp.sqrt(HIDDEN_SIZE)
    w1 = jax.random.uniform(k1, (INPUT_SIZE, HIDDEN_SIZE), jnp.float32,
                            -bound1, bound1)
    b1 = jax.random.uniform(k2, (1, HIDDEN_SIZE), jnp.float32, -bound1, bound1)
    w2 = jax.random.uniform(k3, (HIDDEN_SIZE, OUTPUT_SIZE), jnp.float32,
                            -bound2, bound2)
    b2 = jax.random.uniform(k4, (1, OUTPUT_SIZE), jnp.float32, -bound2, bound2)
    return w1, b1, w2, b2


def _reference(x, w1, b1, w2, b2):
    h = jnp.dot(x, w1, precision=jax.lax.Precision.HIGHEST)
    h = jnp.maximum(h + jnp.reshape(b1, (1, HIDDEN_SIZE)), 0.0)
    return (jnp.dot(h, jnp.reshape(w2, (HIDDEN_SIZE, OUTPUT_SIZE)),
                    precision=jax.lax.Precision.HIGHEST)
            + jnp.reshape(b2, (1, OUTPUT_SIZE)))


if __name__ == "__main__":
    # TODO(synk): the PyTorch forward's `print('in forward')` side-effect is omitted.
    key = jax.random.PRNGKey(0)
    pkey, xkey = jax.random.split(key)
    w1, b1, w2, b2 = init_params(pkey)

    ok = True
    # 8: R=8 tiny single block; 30: ragged (pad path); 200: R=8, 25 groups;
    # 1024: R=16 single block; 8200: R=8, 2 parallel tiles w/ partial tail block.
    for batch in (8, 30, 200, 1024, 8200):
        xk = jax.random.fold_in(xkey, batch)
        x = jax.random.normal(xk, (batch, INPUT_SIZE), jnp.float32)
        out = simple_nn_forward(x, w1, b1, w2, b2)
        jax.block_until_ready(out)
        ref = _reference(x, w1, b1, w2, b2)
        ok &= out.shape == (batch, OUTPUT_SIZE)
        ok &= bool(jnp.allclose(out, ref, atol=1e-4, rtol=1e-4))

    assert ok
    print("KERNEL_OK")
</pallas_src>

<mosaic_0001>
module attributes {stable_mosaic.version = 11 : i64} {
  func.func @simple_nn_kernel(%arg0: i32, %arg1: memref<80x40xf32, #tpu.memory_space<vmem>>, %arg2: memref<1x40xf32, #tpu.memory_space<vmem>>, %arg3: memref<1x40xf32, #tpu.memory_space<vmem>>, %arg4: memref<1xf32, #tpu.memory_space<smem>>, %arg5: memref<1x80xf32, #tpu.memory_space<vmem>>, %arg6: memref<1x8xf32, #tpu.memory_space<vmem>>) attributes {dimension_semantics = [#tpu.dimension_semantics<parallel>], iteration_bounds = array<i64: 1>, scalar_prefetch = 0 : i64, scratch_operands = 0 : i64, tpu.core_type = #tpu.core_type<tc>, window_params = [{pipeline_mode = #tpu.pipeline_mode<synchronous>, transform_indices = @transform_0, window_bounds = array<i64: 80, 40>}, {pipeline_mode = #tpu.pipeline_mode<synchronous>, transform_indices = @transform_1, window_bounds = array<i64: 1, 40>}, {pipeline_mode = #tpu.pipeline_mode<synchronous>, transform_indices = @transform_2, window_bounds = array<i64: 1, 40>}, {transform_indices = @transform_3, window_bounds = array<i64: 1>}, {transform_indices = @transform_4, window_bounds = array<i64: 1, 80>}, {transform_indices = @transform_5, window_bounds = array<i64: 1, 8>}]} {
    %c0 = arith.constant 0 : index
    %c0_0 = arith.constant 0 : index
    %0 = vector.load %arg5[%c0, %c0_0] : memref<1x80xf32, #tpu.memory_space<vmem>>, vector<1x80xf32>
    %c0_1 = arith.constant 0 : index
    %c0_2 = arith.constant 0 : index
    %1 = vector.load %arg1[%c0_1, %c0_2] : memref<80x40xf32, #tpu.memory_space<vmem>>, vector<80x40xf32>
    %cst = arith.constant dense<0.000000e+00> : vector<1x40xf32>
    %2 = tpu.matmul %0, %1, %cst {dimension_numbers = #tpu.dot_dimension_numbers<[1], [0], [0], [1], [0, 0, 1, 1], [], []>} : vector<1x80xf32>, vector<80x40xf32>, vector<1x40xf32> -> vector<1x40xf32>
    %c0_3 = arith.constant 0 : index
    %c0_4 = arith.constant 0 : index
    %3 = vector.load %arg2[%c0_3, %c0_4] : memref<1x40xf32, #tpu.memory_space<vmem>>, vector<1x40xf32>
    %4 = arith.addf %2, %3 : vector<1x40xf32>
    %cst_5 = arith.constant 0.000000e+00 : f32
    %5 = vector.broadcast %cst_5 : f32 to vector<1x40xf32>
    %6 = arith.maximumf %4, %5 : vector<1x40xf32>
    %c0_6 = arith.constant 0 : index
    %c0_7 = arith.constant 0 : index
    %7 = vector.load %arg3[%c0_6, %c0_7] : memref<1x40xf32, #tpu.memory_space<vmem>>, vector<1x40xf32>
    %8 = arith.mulf %6, %7 : vector<1x40xf32>
    %9 = vector.extract_strided_slice %8 {offsets = [0, 0], sizes = [1, 8], strides = [1, 1]} : vector<1x40xf32> to vector<1x8xf32>
    %10 = vector.extract_strided_slice %8 {offsets = [0, 8], sizes = [1, 8], strides = [1, 1]} : vector<1x40xf32> to vector<1x8xf32>
    %11 = arith.addf %9, %10 : vector<1x8xf32>
    %12 = vector.extract_strided_slice %8 {offsets = [0, 16], sizes = [1, 8], strides = [1, 1]} : vector<1x40xf32> to vector<1x8xf32>
    %13 = arith.addf %11, %12 : vector<1x8xf32>
    %14 = vector.extract_strided_slice %8 {offsets = [0, 24], sizes = [1, 8], strides = [1, 1]} : vector<1x40xf32> to vector<1x8xf32>
    %15 = arith.addf %13, %14 : vector<1x8xf32>
    %16 = vector.extract_strided_slice %8 {offsets = [0, 32], sizes = [1, 8], strides = [1, 1]} : vector<1x40xf32> to vector<1x8xf32>
    %17 = arith.addf %15, %16 : vector<1x8xf32>
    %c0_8 = arith.constant 0 : index
    %18 = memref.load %arg4[%c0_8] : memref<1xf32, #tpu.memory_space<smem>>
    %19 = vector.broadcast %18 : f32 to vector<1x8xf32>
    %20 = arith.addf %17, %19 : vector<1x8xf32>
    %c0_9 = arith.constant 0 : index
    %c0_10 = arith.constant 0 : index
    %21 = vector.load %arg6[%c0_9, %c0_10] : memref<1x8xf32, #tpu.memory_space<vmem>>, vector<1x8xf32>
    tpu.vector_store %arg6[%c0_9, %c0_10], %20 {strides = array<i32>} : memref<1x8xf32, #tpu.memory_space<vmem>>, vector<1x8xf32>,
    return
  }
  func.func @transform_0(%arg0: i32) -> (i32, i32) {
    %c0_i32 = arith.constant 0 : i32
    %c0_i32_0 = arith.constant 0 : i32
    %c0_i32_1 = arith.constant 0 : i32
    return %c0_i32, %c0_i32_0 : i32, i32
  }
  func.func @transform_1(%arg0: i32) -> (i32, i32) {
    %c0_i32 = arith.constant 0 : i32
    %c0_i32_0 = arith.constant 0 : i32
    %c0_i32_1 = arith.constant 0 : i32
    return %c0_i32, %c0_i32_0 : i32, i32
  }
  func.func @transform_2(%arg0: i32) -> (i32, i32) {
    %c0_i32 = arith.constant 0 : i32
    %c0_i32_0 = arith.constant 0 : i32
    %c0_i32_1 = arith.constant 0 : i32
    return %c0_i32, %c0_i32_0 : i32, i32
  }
  func.func @transform_3(%arg0: i32) -> i32 {
    %c0_i32 = arith.constant 0 : i32
    %c0_i32_0 = arith.constant 0 : i32
    return %c0_i32 : i32
  }
  func.func @transform_4(%arg0: i32) -> (i32, i32) {
    %c0_i32 = arith.constant 0 : i32
    %c0_i32_0 = arith.constant 0 : i32
    return %arg0, %c0_i32 : i32, i32
  }
  func.func @transform_5(%arg0: i32) -> (i32, i32) {
    %c0_i32 = arith.constant 0 : i32
    %c0_i32_0 = arith.constant 0 : i32
    return %arg0, %c0_i32 : i32, i32
  }
}

</mosaic_0001>

<bundles_post_ra>
// kernel: tpu_custom_call.1
= control target key start
LH: loop header
LB: loop body
LE: loop exit
PB: predicated region body
PF: predicated region fallthrough
CT: control target
= control target key end

     0   :  { %v229_v3 = vmov 0.0|0.0   ;;  %vm230_vm0 = vmmov 0   ;;  %v231_v6 = vmov 0.0   ;;  %s321_s0 = inlined_call_operand.vmem [shape: f32[80,40], index: 0, kind: input, shape index: {}]   ;;  %s322_s1 = inlined_call_operand.vmem [shape: f32[1,40], index: 1, kind: input, shape index: {}]   ;;  %s323_s2 = inlined_call_operand.vmem [shape: f32[1,40], index: 2, kind: input, shape index: {}]   ;;  %s324_s3 = inlined_call_operand.<no memory space> [shape: f32[1], index: 3, kind: input, shape index: {}]   ;;  %s325_s4 = inlined_call_operand.vmem [shape: f32[1,80], index: 4, kind: input, shape index: {}]   ;;  %s326_s5 = inlined_call_operand.hbm [shape: f32[1,8], index: 5, kind: output, shape index: {}]  }
   0x1   :  { %v23_v0 = vld [vmem:[%s321_s0] sm:$0xff]  ;;  %v24_v1 = vld [vmem:[%s321_s0 + $0x8] sm:$0xff]  ;;  %v25_v2 = vld [vmem:[%s321_s0 + $0x10] sm:$0xff]  ;;  %182 = vmatprep.subr.bf16.mxu0 %v229_v3  ;;  %179 = vmatprep.mubr.msk.f32.mxu0 %vm230_vm0, %v231_v6 }
   0x2   :  { %v183_v4 = vpack.c.bf16 %v24_v1, %v23_v0  ;;  %v26_v5 = vld [vmem:[%s321_s0 + $0x18] sm:$0xff]  ;;  %v27_v8 = vld [vmem:[%s321_s0 + $0x20] sm:$0xff]  ;;  %v28_v9 = vld [vmem:[%s321_s0 + $0x28] sm:$0xff] }
   0x3   :  { %v186_v7 = vpack.c.bf16 %v26_v5, %v25_v2 }
   0x4   :  { %184 = vmatpush3.bf16.msra.mxu0 %v183_v4 }
   0x5   :  { %185 = vmatprep.subr.bf16.mxu0 %v229_v3 }
   0x6   :  { %11 = vsyncpa [#allocation4], 0  ;;  %v189_v10 = vpack.c.bf16 %v28_v9, %v27_v8  ;;  %v29_v11 = vld [vmem:[%s321_s0 + $0x30] sm:$0xff]  ;;  %v30_v12 = vld [vmem:[%s321_s0 + $0x38] sm:$0xff]  ;;  %vm34_vm1 = vcmask 654336   ;;  %s233_s19 = smov 120   ;;  %v129_v32 = vstv %s324_s3 }
   0x7   :  { %v192_v13 = vpack.c.bf16 %v30_v12, %v29_v11  ;;  %v31_v14 = vld [vmem:[%s321_s0 + $0x40] sm:$0xff]  ;;  %v32_v15 = vld [vmem:[%s321_s0 + $0x48] sm:$0xff]  ;;  %s232_s0 = smov 104   ;;  %s235_s20 = smov 112   ;;  %vm131_vm2 = vcmask 57344  }
   0x8   :  { %187 = vmatpush3.bf16.msra.mxu0 %v186_v7  ;;  %v195_v16 = vpack.c.bf16 %v32_v15, %v31_v14  ;;  %v22_v17 = vld [vmem:[%s325_s4] sm:$0x1]  ;;  %s234_s4 = smov 96  }
   0x9   :  { %188 = vmatprep.subr.bf16.mxu0 %v229_v3  ;;  %v33_v18 = vld [vmem:[%s322_s1] sm:$0x1] }
   0xa   :  { %v109_v22 = vld [vmem:[%s323_s2] sm:$0x1]  ;;  %s236_s2 = smov [#allocation3]  }
   0xb   :  { %s139_s22 = sshll.u32 %s236_s2, 4  ;;  %s140_s22 = int_to_ptr.vmem [resolvable:$true] %s139_s22 }
   0xc   :  { %190 = vmatpush3.bf16.msra.mxu0 %v189_v10  ;;  %s205_s23 = scalar_lea.vmem %s140_s22, 16  ;;  %s209_s24 = scalar_lea.vmem %s140_s22, 32 }
   0xd   :  { %191 = vmatprep.subr.bf16.mxu0 %v229_v3  ;;  %p206_p0 = scmp.ne.s32.totalorder %s140_s22, %s205_s23  ;;  %p210_p1 = scmp.lt.s32.totalorder %s140_s22, %s140_s22 }
   0xe   :  { %p211_p2 = scmp.lt.s32.totalorder %s209_s24, %s205_s23 }
  0x10   :  { %193 = vmatpush3.bf16.msra.mxu0 %v192_v13  ;;  %p212_p3 = por %p211_p2, %p210_p1 }
  0x11   :  { %194 = vmatprep.subr.bf16.mxu0 %v229_v3 }
  0x12   :  { %p213_p4 = pnand %p212_p3, %p206_p0 }
  0x14   :  { %196 = vmatpush3.bf16.msra.mxu0 %v195_v16 }
  0x17   :  { %180 = vmatmul.mubr.msk.f32.vlgmr.msra.gmra.mrb[0].mxu0 %vm34_vm1, %v22_v17 }
  0xea   :  { %v104_v19 = vpop.f32.mrb[0].mxu0 }
  0xeb   :  { %v105_v20 = vadd.f32 %v104_v19, %v33_v18  ;;  %v181_v21 = vpop.f32.mrb[1].mxu0 }
  0xed   :  { %v108_v23 = vmax.f32 %v105_v20, 0.0 }
  0xef   :  { %v110_v24 = vmul.f32 %v109_v22, %v108_v23 }
  0xf1   :  { %120 = vrot.lane.b32.xlu1 %v110_v24, %s232_s0  ;;  %112 = vrot.lane.b32.xlu0 %v110_v24, %s233_s19 }
  0xf5   :  { %124 = vrot.lane.b32.xlu1 %v110_v24, %s234_s4  ;;  %116 = vrot.lane.b32.xlu0 %v110_v24, %s235_s20 }
 0x163   :  { %v113_v25 = vpop.permute.xlu0 %112  ;;  %v121_v26 = vpop.permute.xlu1 %120 }
 0x164   :  { %v115_v27 = vadd.f32 %v113_v25, %v110_v24 }
 0x167   :  { %v117_v28 = vpop.permute.xlu0 %116  ;;  %v125_v31 = vpop.permute.xlu1 %124 }
 0x168   :  { %v119_v29 = vadd.f32 %v117_v28, %v115_v27 }
 0x16a   :  { %v123_v30 = vadd.f32 %v121_v26, %v119_v29 }
 0x16c   :  { %v127_v33 = vadd.f32 %v125_v31, %v123_v30 }
 0x16e   :  { %v130_v34 = vadd.f32 %v129_v32, %v127_v33 }
 0x170   :  { %132 = vst.msk [vmem:[#allocation3] sm:$0x1] %vm131_vm2, %v130_v34 }
 0x171   :  { %216 = shalt.err (!%p213_p4)
}
 0x172   :  { %s217_s27 = scalar_lea.hbm %s326_s5, 16 }
 0x173   :  { %p218_p5 = scmp.ne.s32.totalorder %s326_s5, %s217_s27  ;;  %p221_p6 = scmp.lt.u32.totalorder %s217_s27, %s326_s5 }
 0x175   :  { %p223_p7 = pnand %p221_p6, %p218_p5 }
 0x177   :  { %226 = shalt.err (!%p223_p7)
}
 0x178   :  { %142 = dma.vmem_to_hbm [thread:$0]  %s140_s22, 16, %s326_s5, [#allocation4]  }
 0x179   :  { %227 = dma.done.wait [#allocation4], 16  }
 0x17a   :  { %228 = vsyncadd [#allocation4], 4294967280 }
 0x17b   :  { %146 = vsyncpa [#allocation4], 1 }

</bundles_post_ra>
